<compile_context>
chip_gen: v7x
topology: tpu7x:2x2x1
jax: 0.10.0
libtpu: 0.0.40
codegen_flags: <defaults>
</compile_context>

<pallas_src>
import jax
import jax.numpy as jnp
from jax.experimental import pallas as pl
from jax.experimental.pallas import tpu as pltpu

_LANE = 128


def _adaptive_avg_pool_matrix(seq_len: int, target_len: int) -> jnp.ndarray:
    """P [T, L] with PyTorch AdaptiveAvgPool1d window semantics (exact integer windows)."""
    rows = []
    for i in range(target_len):
        start = (i * seq_len) // target_len
        end = ((i + 1) * seq_len + target_len - 1) // target_len   # integer ceil
        row = [0.0] * seq_len
        w = 1.0 / (end - start)
        for j in range(start, end):
            row[j] = w
        rows.append(row)
    return jnp.asarray(rows, dtype=jnp.float32)


def prepare_projection_weight(proj_weight: jnp.ndarray, lane_multiple: int = _LANE) -> jnp.ndarray:
    """One-time weight prep (do at model init, NOT per forward).

    proj_weight: [O, C] (PyTorch nn.Linear layout) -> [C, O_pad] bf16, O_pad a multiple of 128.
    """
    O, C = proj_weight.shape
    o_pad = ((O + lane_multiple - 1) // lane_multiple) * lane_multiple
    w = proj_weight.T.astype(jnp.bfloat16)                       # [C, O]
    if o_pad != O:
        w = jnp.pad(w, ((0, 0), (0, o_pad - O)))                  # zero-padded extra columns
    return w


def _vmem_capacity_bytes() -> int:
    try:
        return int(pltpu.get_tpu_info().vmem_capacity_bytes)
    except Exception:
        return 64 * 1024 * 1024            # conservative default (v7x per-core VMEM)


def _choose_tiles(B, L, C, T, O_pad, out_itemsize, vmem_budget, max_unroll=16):
    """Pick (b_block, o_tile, vmem_need_bytes) against the VMEM budget."""
    # Whole weight resident when it is small; else largest lane tile that divides O_pad.
    if C * O_pad * 2 <= (4 << 20):
        o_tiles = [O_pad]
    else:
        o_tiles = [t for t in (512, 256, 128) if O_pad % t == 0] or [O_pad]

    divisors = sorted({d for d in range(1, B + 1) if B % d == 0})

    def need_bytes(bb, ot):
        M = bb * T
        return (2 * bb * L * C * 2            # bf16 x block (double-buffered)
                + 2 * C * ot * 2              # bf16 weight tile (double-buffered)
                + 2 * M * ot * out_itemsize   # output block (double-buffered)
                + M * C * 2                   # pooled scratch (bf16)
                + 2 * T * L * 2)              # pooling matrix (resident)

    def aligned(bb):
        # Blocks equal to the full array are always legal; tiled axes need 8-row alignment.
        return bb == B or ((bb * L) % 8 == 0 and (bb * T) % 8 == 0)

    for ot in o_tiles:
        feas = [d for d in divisors
                if d <= max_unroll and aligned(d) and need_bytes(d, ot) <= vmem_budget]
        if not feas:
            continue
        in_range = [d for d in feas if 128 <= d * T <= 512]
        if in_range:
            split = [d for d in in_range if B // d >= 2]    # keep both v7x TCs busy if possible
            bb = max(split) if split else max(in_range)
        else:
            bb = max(feas)                                   # tiny shapes: biggest block wins
        return bb, ot, need_bytes(bb, ot)

    # Last resort (shouldn't trigger for realistic shapes): smallest tiles.
    ot = min(o_tiles)
    bb = 1 if aligned(1) else B
    return bb, ot, need_bytes(bb, ot)


def _make_kernel(b_block: int, T: int, L: int):
    """Refs: p_ref [T, L] bf16, x_ref [b_block*L, C] bf16, w_ref [C, o_tile] bf16,
             o_ref [b_block*T, o_tile] out_dtype, pooled_ref [b_block*T, C] bf16 scratch.
    Grid: (batch_block i, o_tile j).  Pooling runs once per batch block at j == 0 and is
    reused across all O tiles."""

    def kernel(p_ref, x_ref, w_ref, o_ref, pooled_ref):
        @pl.when(pl.program_id(1) == 0)
        def _pool():
            p = p_ref[...]                                   # [T, L] bf16, hoisted
            for b in range(b_block):                         # small static unroll (<= 16)
                xb = x_ref[pl.ds(b * L, L), :]               # [L, C] bf16
                pooled = jnp.dot(p, xb, preferred_element_type=jnp.float32)
                pooled_ref[pl.ds(b * T, T), :] = pooled.astype(pooled_ref.dtype)

        # Projection: [b_block*T, C] bf16 @ [C, o_tile] bf16 -> f32 acc (native-rate MXU).
        out = jnp.dot(pooled_ref[...], w_ref[...], preferred_element_type=jnp.float32)
        o_ref[...] = out.astype(o_ref.dtype)

    return kernel


def modality_projector_adaptive_pool(x, w_prepared, target_length, out_dim, *,
                                     out_dtype=jnp.float32, b_block=None):
    """
    x:           [B, L, C] audio features (any float dtype; cast to bf16 for the kernel)
    w_prepared:  [C, O_pad] bf16 from prepare_projection_weight()
    returns:     [B, target_length, out_dim] out_dtype
    """
    B, L, C = x.shape
    Cw, O_pad = w_prepared.shape
    assert Cw == C and O_pad % _LANE == 0 and out_dim <= O_pad
    T = int(target_length)
    out_itemsize = jnp.dtype(out_dtype).itemsize

    vmem_cap = _vmem_capacity_bytes()
    budget = int(0.7 * min(vmem_cap, 128 << 20))
    bb_auto, o_tile, need = _choose_tiles(B, L, C, T, O_pad, out_itemsize, budget)
    if b_block is None:
        b_block = bb_auto
    assert B % b_block == 0
    nb = B // b_block
    no = O_pad // o_tile
    M = b_block * T

    # Explicit VMEM limit from the block arithmetic (default scoped limits are far below
    # physical VMEM); keep headroom, never exceed the part's capacity.
    vmem_limit = int(min(int(0.92 * vmem_cap), max(2 * need + (8 << 20), 32 << 20)))

    p_mat = _adaptive_avg_pool_matrix(L, T).astype(jnp.bfloat16)   # exact windows, bf16 operand
    x2d = x.reshape(B * L, C).astype(jnp.bfloat16)                 # halve the dominant HBM read

    cost = pl.CostEstimate(
        flops=int(2 * B * T * L * C + 2 * B * T * C * O_pad),
        transcendentals=0,
        bytes_accessed=int(x2d.size * 2
                           + (1 if no == 1 else nb) * C * O_pad * 2   # W re-fetched per i if tiled
                           + T * L * 2
                           + B * T * O_pad * out_itemsize),
    )

    out2d = pl.pallas_call(
        _make_kernel(b_block, T, L),
        out_shape=jax.ShapeDtypeStruct((B * T, O_pad), out_dtype),
        grid_spec=pltpu.PrefetchScalarGridSpec(
            num_scalar_prefetch=0,
            grid=(nb, no),
            in_specs=[
                pl.BlockSpec((T, L), lambda i, j: (0, 0)),            # pooling matrix, resident
                pl.BlockSpec((b_block * L, C), lambda i, j: (i, 0)),  # bf16 activations slab
                pl.BlockSpec((C, o_tile), lambda i, j: (0, j)),       # bf16 weight (O-)tile
            ],
            out_specs=pl.BlockSpec((M, o_tile), lambda i, j: (i, j)),
            scratch_shapes=[pltpu.VMEM((M, C), jnp.bfloat16)],        # pooled activations
        ),
        compiler_params=pltpu.CompilerParams(
            # Batch blocks are independent -> "parallel" (megacore on v7x); the O-tile axis
            # must stay "arbitrary" because the pooled scratch is reused across it.
            dimension_semantics=("parallel", "arbitrary"),
            vmem_limit_bytes=vmem_limit),
        cost_estimate=cost,
    )(p_mat, x2d, w_prepared)

    return out2d[:, :out_dim].reshape(B, T, out_dim).astype(out_dtype)


# ----------------------------- references (plain JAX) -----------------------------
def _reference_f32(x, proj_weight, target_length):
    """Mirror of the PyTorch forward in f32."""
    p = _adaptive_avg_pool_matrix(x.shape[1], target_length)      # [T, L]
    pooled = jnp.einsum("tl,blc->btc", p, x)                      # adaptive avg pool
    return jnp.einsum("btc,oc->bto", pooled, proj_weight)         # Linear, no bias


def _reference_matched(x, w_prepared, target_length, out_dim):
    """Reference with the same bf16 operand rounding the kernel uses (f32 accumulation)."""
    B, L, C = x.shape
    p = _adaptive_avg_pool_matrix(L, target_length).astype(jnp.bfloat16).astype(jnp.float32)
    xb = x.astype(jnp.bfloat16).astype(jnp.float32)
    pooled = jnp.einsum("tl,blc->btc", p, xb)
    pooled = pooled.astype(jnp.bfloat16).astype(jnp.float32)
    w = w_prepared.astype(jnp.float32)                            # [C, O_pad]
    return jnp.einsum("btc,co->bto", pooled, w)[:, :, :out_dim]


if __name__ == "__main__":
    # Small shapes consistent with the module:
    #   batch=2, seq_len=64, audio_hidden_dim=256, lm_hidden_dim=256, mp_target_length=16
    B, L, C, O, T = 2, 64, 256, 256, 16

    key = jax.random.PRNGKey(0)
    kx, kw = jax.random.split(key)
    x = jax.random.normal(kx, (B, L, C), dtype=jnp.float32)
    # nn.Linear weight [out_dim, in_dim], init normal(mean=0, std=0.02), no bias
    proj_weight = 0.02 * jax.random.normal(kw, (O, C), dtype=jnp.float32)

    # One-time weight preparation (transpose + bf16 cast + pad to lane multiple).
    w_prepared = prepare_projection_weight(proj_weight)

    # --- uniform-window case (L % T == 0) ---
    out = jax.block_until_ready(modality_projector_adaptive_pool(x, w_prepared, T, O))
    assert out.shape == (B, T, O), out.shape
    ref_bf = _reference_matched(x, w_prepared, T, O)
    ref_32 = _reference_f32(x, proj_weight, T)
    assert jnp.allclose(out, ref_bf, atol=2e-3, rtol=1e-2), "mismatch vs matched-precision ref"
    assert jnp.allclose(out, ref_32, atol=3e-2, rtol=3e-2), "mismatch vs f32 reference"

    # --- ragged-window case (L % T != 0): same exact-window pooling matrix path ---
    T2 = 24
    out2 = jax.block_until_ready(modality_projector_adaptive_pool(x, w_prepared, T2, O))
    assert out2.shape == (B, T2, O), out2.shape
    assert jnp.allclose(out2, _reference_matched(x, w_prepared, T2, O), atol=2e-3, rtol=1e-2), \
        "ragged-path mismatch vs matched-precision ref"
    assert jnp.allclose(out2, _reference_f32(x, proj_weight, T2), atol=3e-2, rtol=3e-2), \
        "ragged-path mismatch vs f32 reference"

    # TODO(synk): 'attention' and 'conv_downsample' projection types not implemented
    # (module default is 'adaptive_pool'); 'linear' is the T == L degenerate case.
    print("KERNEL_OK")
</pallas_src>

<mosaic_0001>
module attributes {stable_mosaic.version = 11 : i64} {
  func.func @kernel(%arg0: i32, %arg1: i32, %arg2: memref<16x64xbf16, #tpu.memory_space<vmem>>, %arg3: memref<128x256xbf16, #tpu.memory_space<vmem>>, %arg4: memref<256x256xbf16, #tpu.memory_space<vmem>>, %arg5: memref<32x256xf32, #tpu.memory_space<vmem>>, %arg6: memref<32x256xbf16, #tpu.memory_space<vmem>>) attributes {dimension_semantics = [#tpu.dimension_semantics<parallel>, #tpu.dimension_semantics<arbitrary>], iteration_bounds = array<i64: 1, 1>, scalar_prefetch = 0 : i64, scratch_operands = 1 : i64, tpu.core_type = #tpu.core_type<tc>, window_params = [{pipeline_mode = #tpu.pipeline_mode<synchronous>, transform_indices = @transform_0, window_bounds = array<i64: 16, 64>}, {transform_indices = @transform_1, window_bounds = array<i64: 128, 256>}, {transform_indices = @transform_2, window_bounds = array<i64: 256, 256>}, {transform_indices = @transform_3, window_bounds = array<i64: 32, 256>}]} {
    %c0_i32 = arith.constant 0 : i32
    %0 = arith.cmpi eq, %arg1, %c0_i32 : i32
    %1 = arith.extui %0 : i1 to i32
    %c0_i32_0 = arith.constant 0 : i32
    %2 = arith.cmpi ne, %1, %c0_i32_0 : i32
    scf.if %2 {
      %c0_6 = arith.constant 0 : index
      %c0_7 = arith.constant 0 : index
      %7 = vector.load %arg2[%c0_6, %c0_7] : memref<16x64xbf16, #tpu.memory_space<vmem>>, vector<16x64xbf16>
      %c0_8 = arith.constant 0 : index
      %c0_9 = arith.constant 0 : index
      %8 = vector.load %arg3[%c0_8, %c0_9] : memref<128x256xbf16, #tpu.memory_space<vmem>>, vector<64x256xbf16>
      %cst_10 = arith.constant dense<0.000000e+00> : vector<16x256xf32>
      %9 = tpu.matmul %7, %8, %cst_10 {dimension_numbers = #tpu.dot_dimension_numbers<[1], [0], [0], [1], [0, 0, 1, 1], [], []>} : vector<16x64xbf16>, vector<64x256xbf16>, vector<16x256xf32> -> vector<16x256xf32>
      %10 = arith.truncf %9 : vector<16x256xf32> to vector<16x256xbf16>
      %c0_11 = arith.constant 0 : index
      %c0_12 = arith.constant 0 : index
      %11 = vector.load %arg6[%c0_11, %c0_12] : memref<32x256xbf16, #tpu.memory_space<vmem>>, vector<16x256xbf16>
      tpu.vector_store %arg6[%c0_11, %c0_12], %10 {strides = array<i32>} : memref<32x256xbf16, #tpu.memory_space<vmem>>, vector<16x256xbf16>,
      %c64 = arith.constant 64 : index
      %c0_13 = arith.constant 0 : index
      %12 = vector.load %arg3[%c64, %c0_13] : memref<128x256xbf16, #tpu.memory_space<vmem>>, vector<64x256xbf16>
      %cst_14 = arith.constant dense<0.000000e+00> : vector<16x256xf32>
      %13 = tpu.matmul %7, %12, %cst_14 {dimension_numbers = #tpu.dot_dimension_numbers<[1], [0], [0], [1], [0, 0, 1, 1], [], []>} : vector<16x64xbf16>, vector<64x256xbf16>, vector<16x256xf32> -> vector<16x256xf32>
      %14 = arith.truncf %13 : vector<16x256xf32> to vector<16x256xbf16>
      %c16 = arith.constant 16 : index
      %c0_15 = arith.constant 0 : index
      %15 = vector.load %arg6[%c16, %c0_15] : memref<32x256xbf16, #tpu.memory_space<vmem>>, vector<16x256xbf16>
      tpu.vector_store %arg6[%c16, %c0_15], %14 {strides = array<i32>} : memref<32x256xbf16, #tpu.memory_space<vmem>>, vector<16x256xbf16>,
    } else {
    }
    %c0 = arith.constant 0 : index
    %c0_1 = arith.constant 0 : index
    %3 = vector.load %arg6[%c0, %c0_1] : memref<32x256xbf16, #tpu.memory_space<vmem>>, vector<32x256xbf16>
    %c0_2 = arith.constant 0 : index
    %c0_3 = arith.constant 0 : index
    %4 = vector.load %arg4[%c0_2, %c0_3] : memref<256x256xbf16, #tpu.memory_space<vmem>>, vector<256x256xbf16>
    %cst = arith.constant dense<0.000000e+00> : vector<32x256xf32>
    %5 = tpu.matmul %3, %4, %cst {dimension_numbers = #tpu.dot_dimension_numbers<[1], [0], [0], [1], [0, 0, 1, 1], [], []>} : vector<32x256xbf16>, vector<256x256xbf16>, vector<32x256xf32> -> vector<32x256xf32>
    %c0_4 = arith.constant 0 : index
    %c0_5 = arith.constant 0 : index
    %6 = vector.load %arg5[%c0_4, %c0_5] : memref<32x256xf32, #tpu.memory_space<vmem>>, vector<32x256xf32>
    tpu.vector_store %arg5[%c0_4, %c0_5], %5 {strides = array<i32>} : memref<32x256xf32, #tpu.memory_space<vmem>>, vector<32x256xf32>,
    return
  }
  func.func @transform_0(%arg0: i32, %arg1: i32) -> (i32, i32) {
    %c0_i32 = arith.constant 0 : i32
    %c0_i32_0 = arith.constant 0 : i32
    %c0_i32_1 = arith.constant 0 : i32
    return %c0_i32, %c0_i32_0 : i32, i32
  }
  func.func @transform_1(%arg0: i32, %arg1: i32) -> (i32, i32) {
    %c0_i32 = arith.constant 0 : i32
    %c0_i32_0 = arith.constant 0 : i32
    return %arg0, %c0_i32 : i32, i32
  }
  func.func @transform_2(%arg0: i32, %arg1: i32) -> (i32, i32) {
    %c0_i32 = arith.constant 0 : i32
    %c0_i32_0 = arith.constant 0 : i32
    return %c0_i32, %arg1 : i32, i32
  }
  func.func @transform_3(%arg0: i32, %arg1: i32) -> (i32, i32) {
    %c0_i32 = arith.constant 0 : i32
    return %arg0, %arg1 : i32, i32
  }
}

</mosaic_0001>

<bundles_post_ra>
// kernel: tpu_custom_call.1
= control target key start
LH: loop header
LB: loop body
LE: loop exit
PB: predicated region body
PF: predicated region fallthrough
CT: control target
= control target key end

     0   :  { %8 = vsyncpa [#allocation4], 0  ;;  %s853_s0 = inlined_call_operand.hbm [shape: bf16[16,64], index: 0, kind: input, shape index: {}]   ;;  %s854_s1 = inlined_call_operand.hbm [shape: bf16[128,256], index: 1, kind: input, shape index: {}]   ;;  %s855_s2 = inlined_call_operand.hbm [shape: bf16[256,256], index: 2, kind: input, shape index: {}]   ;;  %s856_s3 = inlined_call_operand.hbm [shape: f32[32,256], index: 3, kind: output, shape index: {}]  }
   0x1   :  { %9 = vsyncpa [#allocation7], 0 }
   0x2   :  { %10 = vsyncpa [#allocation5], 0  ;;  %s766_s12 = smov [#allocation6]   ;;  %s672_s16 = scalar_lea.hbm %s854_s1, 2048 }
   0x3   :  { %s28_s13 = sshll.u32 %s766_s12, 4  ;;  %p673_p0 = scmp.ne.s32.totalorder %s854_s1, %s672_s16  ;;  %s29_s13 = int_to_ptr.vmem [resolvable:$true] %s28_s13 }
   0x4   :  { %p676_p1 = scmp.lt.u32.totalorder %s672_s16, %s854_s1 }
   0x6   :  { %p678_p2 = pnand %p676_p1, %p673_p0 }
   0x8   :  { %681 = shalt.err (!%p678_p2)
}
   0x9   :  { %s682_s21 = scalar_lea.vmem %s29_s13, 2048  ;;  %p687_p4 = scmp.lt.s32.totalorder %s29_s13, %s29_s13 }
   0xa   :  { %p683_p3 = scmp.ne.s32.totalorder %s29_s13, %s682_s21  ;;  %p688_p5 = scmp.lt.s32.totalorder %s682_s21, %s682_s21 }
   0xc   :  { %p689_p6 = por %p688_p5, %p687_p4 }
   0xe   :  { %p690_p7 = pnand %p689_p6, %p683_p3 }
  0x10   :  { %693 = shalt.err (!%p690_p7)
}
  0x11   :  { %s767_s22 = smov 128   ;;  %s768_s23 = smov 8  }
  0x12   :  { %34 = dma.hbm_to_vmem [thread:$0]  %s854_s1, 2048, %s29_s13, [#allocation7], %s767_s22, %s767_s22, %s768_s23  }
  0x13   :  { %s769_s26 = smov [#allocation3]   ;;  %s694_s30 = scalar_lea.hbm %s853_s0, 128 }
  0x14   :  { %s16_s27 = sshll.u32 %s769_s26, 4  ;;  %p695_p8 = scmp.ne.s32.totalorder %s853_s0, %s694_s30  ;;  %s17_s27 = int_to_ptr.vmem [resolvable:$true] %s16_s27 }
  0x15   :  { %p698_p9 = scmp.lt.u32.totalorder %s694_s30, %s853_s0 }
  0x17   :  { %p700_p10 = pnand %p698_p9, %p695_p8 }
  0x19   :  { %703 = shalt.err (!%p700_p10)
}
  0x1a   :  { %s704_s8 = scalar_lea.vmem %s17_s27, 128  ;;  %p709_p12 = scmp.lt.s32.totalorder %s17_s27, %s17_s27 }
  0x1b   :  { %p705_p11 = scmp.ne.s32.totalorder %s17_s27, %s704_s8  ;;  %p710_p13 = scmp.lt.s32.totalorder %s704_s8, %s704_s8 }
  0x1d   :  { %p711_p0 = por %p710_p13, %p709_p12 }
  0x1f   :  { %p712_p1 = pnand %p711_p0, %p705_p11 }
  0x21   :  { %715 = shalt.err (!%p712_p1)
}
  0x22   :  { %s770_s1 = smov 64   ;;  %s771_s9 = smov 4  }
  0x23   :  { %22 = dma.hbm_to_vmem [thread:$0]  %s853_s0, 128, %s17_s27, [#allocation4], %s770_s1, %s770_s1, %s771_s9  }
  0x24   :  { %s772_s12 = smov [#allocation8]   ;;  %s716_s16 = scalar_lea.hbm %s855_s2, 4096 }
  0x25   :  { %s40_s13 = sshll.u32 %s772_s12, 4  ;;  %p717_p2 = scmp.ne.s32.totalorder %s855_s2, %s716_s16  ;;  %s41_s13 = int_to_ptr.vmem [resolvable:$true] %s40_s13 }
  0x26   :  { %p720_p3 = scmp.lt.u32.totalorder %s716_s16, %s855_s2 }
  0x28   :  { %p722_p4 = pnand %p720_p3, %p717_p2 }
  0x2a   :  { %725 = shalt.err (!%p722_p4)
}
  0x2b   :  { %s726_s21 = scalar_lea.vmem %s41_s13, 4096  ;;  %p731_p6 = scmp.lt.s32.totalorder %s41_s13, %s41_s13 }
  0x2c   :  { %p727_p5 = scmp.ne.s32.totalorder %s41_s13, %s726_s21  ;;  %p732_p7 = scmp.lt.s32.totalorder %s726_s21, %s726_s21 }
  0x2e   :  { %p733_p8 = por %p732_p7, %p731_p6 }
  0x30   :  { %p734_p9 = pnand %p733_p8, %p727_p5 }
  0x32   :  { %737 = shalt.err (!%p734_p9)
}
  0x33   :  { %46 = dma.hbm_to_vmem [thread:$0]  %s855_s2, 4096, %s41_s13, [#allocation7], %s767_s22, %s767_s22, %s768_s23  }
  0x34   :  { %760 = dma.done.wait [#allocation4], 128  }
  0x35   :  { %761 = vsyncadd [#allocation4], 4294967168 }
  0x36   :  { %762 = dma.done.wait [#allocation7], 6144  }
  0x37   :  { %763 = vsyncadd [#allocation7], 4294961152  ;;  %v773_v0 = vmov 0   ;;  %v599_v1 = vld [vmem:[#allocation6 + $0x4] ss:$8 sps:$4 sm:$0xff]   ;;  %v611_v13 = vld [vmem:[#allocation3] sm:$0xff]  }
  0x38   :  { %152 = vmatprep.mubr.bf16.mxu1 %v773_v0  ;;  %v601_v2 = vld [vmem:[#allocation6] ss:$8 sps:$4 sm:$0xff]   ;;  %120 = vmatprep.subr.bf16.mxu1 %v599_v1  ;;  %v602_v3 = vld [vmem:[#allocation6 + $0x14] ss:$8 sps:$4 sm:$0xff]   ;;  %v604_v4 = vld [vmem:[#allocation6 + $0x10] ss:$8 sps:$4 sm:$0xff]  }
  0x39   :  { %121 = vmatpush1.bf16.msra.mxu1 %v601_v2  ;;  %v605_v5 = vld [vmem:[#allocation6 + $0x24] ss:$8 sps:$4 sm:$0xff]   ;;  %v607_v6 = vld [vmem:[#allocation6 + $0x20] ss:$8 sps:$4 sm:$0xff]   ;;  %v608_v7 = vld [vmem:[#allocation6 + $0x34] ss:$8 sps:$4 sm:$0xff]  }
  0x3a   :  { %122 = vmatprep.subr.bf16.mxu1 %v602_v3  ;;  %v610_v8 = vld [vmem:[#allocation6 + $0x30] ss:$8 sps:$4 sm:$0xff]   ;;  %v614_v9 = vld [vmem:[#allocation6 + $0x44] ss:$8 sps:$4 sm:$0xff]   ;;  %v626_v11 = vld [vmem:[#allocation8] ss:$8 sps:$4 sm:$0xff]  }
  0x3b   :  { %v624_v10 = vld [vmem:[#allocation8 + $0x4] ss:$8 sps:$4 sm:$0xff]   ;;  %v627_v12 = vld [vmem:[#allocation8 + $0x14] ss:$8 sps:$4 sm:$0xff]   ;;  %vm116_vm0 = vcmask 523264   ;;  %s774_s2 = smov [#allocation9]  }
  0x3c   :  { %458 = vmatprep.subr.bf16.mxu0 %v624_v10  ;;  %v612_v14 = vld [vmem:[#allocation6 + $0x40] ss:$8 sps:$4 sm:$0xff]   ;;  %v617_v15 = vld [vmem:[#allocation6 + $0x54] ss:$8 sps:$4 sm:$0xff]   ;;  %v629_v16 = vld [vmem:[#allocation8 + $0x10] ss:$8 sps:$4 sm:$0xff]  }
  0x3d   :  { %123 = vmatpush1.bf16.msra.mxu1 %v604_v4  ;;  %459 = vmatpush1.bf16.msra.mxu0 %v626_v11  ;;  %v630_v17 = vld [vmem:[#allocation8 + $0x24] ss:$8 sps:$4 sm:$0xff]   ;;  %v615_v18 = vld [vmem:[#allocation6 + $0x50] ss:$8 sps:$4 sm:$0xff]   ;;  %v632_v20 = vld [vmem:[#allocation8 + $0x20] ss:$8 sps:$4 sm:$0xff]  }
  0x3e   :  { %124 = vmatprep.subr.bf16.mxu1 %v605_v5  ;;  %460 = vmatprep.subr.bf16.mxu0 %v627_v12  ;;  %v620_v19 = vld [vmem:[#allocation6 + $0x64] ss:$8 sps:$4 sm:$0xff]   ;;  %v633_v21 = vld [vmem:[#allocation8 + $0x34] ss:$8 sps:$4 sm:$0xff]   ;;  %v618_v22 = vld [vmem:[#allocation6 + $0x60] ss:$8 sps:$4 sm:$0xff]  }
  0x3f   :  { %v623_v23 = vld [vmem:[#allocation6 + $0x74] ss:$8 sps:$4 sm:$0xff]   ;;  %v635_v24 = vld [vmem:[#allocation8 + $0x30] ss:$8 sps:$4 sm:$0xff]   ;;  %v636_v25 = vld [vmem:[#allocation8 + $0x44] ss:$8 sps:$4 sm:$0xff]  }
  0x40   :  { %v621_v26 = vld [vmem:[#allocation6 + $0x70] ss:$8 sps:$4 sm:$0xff]   ;;  %v638_v27 = vld [vmem:[#allocation8 + $0x40] ss:$8 sps:$4 sm:$0xff]   ;;  %v639_v28 = vld [vmem:[#allocation8 + $0x54] ss:$8 sps:$4 sm:$0xff]  }
  0x41   :  { %125 = vmatpush1.bf16.msra.mxu1 %v607_v6  ;;  %461 = vmatpush1.bf16.msra.mxu0 %v629_v16  ;;  %v641_v29 = vld [vmem:[#allocation8 + $0x50] ss:$8 sps:$4 sm:$0xff]   ;;  %v642_v30 = vld [vmem:[#allocation8 + $0x64] ss:$8 sps:$4 sm:$0xff]   ;;  %v644_v31 = vld [vmem:[#allocation8 + $0x60] ss:$8 sps:$4 sm:$0xff]  }
  0x42   :  { %126 = vmatprep.subr.bf16.mxu1 %v608_v7  ;;  %462 = vmatprep.subr.bf16.mxu0 %v630_v17  ;;  %v645_v32 = vld [vmem:[#allocation8 + $0x74] ss:$8 sps:$4 sm:$0xff]   ;;  %v647_v33 = vld [vmem:[#allocation8 + $0x70] ss:$8 sps:$4 sm:$0xff]   ;;  %v648_v34 = vld [vmem:[#allocation8 + $0x84] ss:$8 sps:$4 sm:$0xff]  }
  0x43   :  { %v650_v35 = vld [vmem:[#allocation8 + $0x80] ss:$8 sps:$4 sm:$0xff]   ;;  %v651_v36 = vld [vmem:[#allocation8 + $0x94] ss:$8 sps:$4 sm:$0xff]   ;;  %v653_v37 = vld [vmem:[#allocation8 + $0x90] ss:$8 sps:$4 sm:$0xff]  }
  0x44   :  { %v654_v38 = vld [vmem:[#allocation8 + $0xa4] ss:$8 sps:$4 sm:$0xff]   ;;  %v656_v39 = vld [vmem:[#allocation8 + $0xa0] ss:$8 sps:$4 sm:$0xff]   ;;  %v657_v40 = vld [vmem:[#allocation8 + $0xb4] ss:$8 sps:$4 sm:$0xff]  }
  0x45   :  { %127 = vmatpush1.bf16.msra.mxu1 %v610_v8  ;;  %463 = vmatpush1.bf16.msra.mxu0 %v632_v20  ;;  %v659_v41 = vld [vmem:[#allocation8 + $0xb0] ss:$8 sps:$4 sm:$0xff]   ;;  %v660_v42 = vld [vmem:[#allocation8 + $0xc4] ss:$8 sps:$4 sm:$0xff]   ;;  %v662_v43 = vld [vmem:[#allocation8 + $0xc0] ss:$8 sps:$4 sm:$0xff]  }
  0x46   :  { %215 = vmatprep.subr.bf16.mxu1 %v614_v9  ;;  %464 = vmatprep.subr.bf16.mxu0 %v633_v21  ;;  %v663_v44 = vld [vmem:[#allocation8 + $0xd4] ss:$8 sps:$4 sm:$0xff]   ;;  %v665_v45 = vld [vmem:[#allocation8 + $0xd0] ss:$8 sps:$4 sm:$0xff]   ;;  %v666_v46 = vld [vmem:[#allocation8 + $0xe4] ss:$8 sps:$4 sm:$0xff]  }
  0x47   :  { %v668_v47 = vld [vmem:[#allocation8 + $0xe0] ss:$8 sps:$4 sm:$0xff]   ;;  %v669_v48 = vld [vmem:[#allocation8 + $0xf4] ss:$8 sps:$4 sm:$0xff]   ;;  %v671_v49 = vld [vmem:[#allocation8 + $0xf0] ss:$8 sps:$4 sm:$0xff]  }
  0x48   :  { %546 = vmatmul.mubr.msk.bf16.vlgmr.msra.gmra.mrb[0].mxu1 %vm116_vm0, %v611_v13  ;;  %s524_s22 = sshll.u32 %s774_s2, 4  ;;  %s525_s22 = int_to_ptr.vmem [resolvable:$true] %s524_s22 }
  0x49   :  { %216 = vmatpush1.bf16.msra.mxu1 %v612_v14  ;;  %247 = vmatprep.mubr.bf16.mxu1 %v773_v0  ;;  %s738_s23 = scalar_lea.vmem %s525_s22, 1024  ;;  %p743_p11 = scmp.lt.s32.totalorder %s525_s22, %s525_s22 }
  0x4a   :  { %217 = vmatprep.subr.bf16.mxu1 %v617_v15  ;;  %465 = vmatpush1.bf16.msra.mxu0 %v635_v24  ;;  %p739_p10 = scmp.ne.s32.totalorder %s525_s22, %s738_s23  ;;  %p744_p12 = scmp.lt.s32.totalorder %s738_s23, %s738_s23 }
  0x4b   :  { %466 = vmatprep.subr.bf16.mxu0 %v636_v25 }
  0x4c   :  { %p745_p13 = por %p744_p12, %p743_p11 }
  0x4d   :  { %218 = vmatpush1.bf16.msra.mxu1 %v615_v18 }
  0x4e   :  { %219 = vmatprep.subr.bf16.mxu1 %v620_v19  ;;  %467 = vmatpush1.bf16.msra.mxu0 %v638_v27  ;;  %p746_p0 = pnand %p745_p13, %p739_p10 }
  0x4f   :  { %468 = vmatprep.subr.bf16.mxu0 %v639_v28 }
  0x51   :  { %220 = vmatpush1.bf16.msra.mxu1 %v618_v22 }
  0x52   :  { %221 = vmatprep.subr.bf16.mxu1 %v623_v23  ;;  %469 = vmatpush1.bf16.msra.mxu0 %v641_v29 }
  0x53   :  { %470 = vmatprep.subr.bf16.mxu0 %v642_v30 }
  0x55   :  { %222 = vmatpush1.bf16.msra.mxu1 %v621_v26 }
  0x56   :  { %471 = vmatpush1.bf16.msra.mxu0 %v644_v31 }
  0x57   :  { %472 = vmatprep.subr.bf16.mxu0 %v645_v32 }
  0x58   :  { %555 = vmatmul.mubr.msk.bf16.vlgmr.msra.gmra.mrb[4].mxu1 %vm116_vm0, %v611_v13 }
  0x5a   :  { %473 = vmatpush1.bf16.msra.mxu0 %v647_v33 }
  0x5b   :  { %474 = vmatprep.subr.bf16.mxu0 %v648_v34 }
  0x5e   :  { %475 = vmatpush1.bf16.msra.mxu0 %v650_v35 }
  0x5f   :  { %476 = vmatprep.subr.bf16.mxu0 %v651_v36 }
  0x62   :  { %477 = vmatpush1.bf16.msra.mxu0 %v653_v37 }
  0x63   :  { %478 = vmatprep.subr.bf16.mxu0 %v654_v38 }
  0x66   :  { %479 = vmatpush1.bf16.msra.mxu0 %v656_v39 }
  0x67   :  { %480 = vmatprep.subr.bf16.mxu0 %v657_v40 }
  0x6a   :  { %481 = vmatpush1.bf16.msra.mxu0 %v659_v41 }
  0x6b   :  { %482 = vmatprep.subr.bf16.mxu0 %v660_v42 }
  0x6e   :  { %483 = vmatpush1.bf16.msra.mxu0 %v662_v43 }
  0x6f   :  { %484 = vmatprep.subr.bf16.mxu0 %v663_v44 }
  0x72   :  { %485 = vmatpush1.bf16.msra.mxu0 %v665_v45 }
  0x73   :  { %486 = vmatprep.subr.bf16.mxu0 %v666_v46 }
  0x76   :  { %487 = vmatpush1.bf16.msra.mxu0 %v668_v47 }
  0x77   :  { %488 = vmatprep.subr.bf16.mxu0 %v669_v48 }
  0x7a   :  { %489 = vmatpush1.bf16.msra.mxu0 %v671_v49 }
 0x11b   :  { %v154_v50 = vpop.f32.mrb[0].mxu1 }
 0x11c   :  { %v156_v51 = vpop.f32.mrb[1].mxu1 }
 0x11d   :  { %v158_v52 = vpop.f32.mrb[2].mxu1 }
 0x11e   :  { %v163_v53 = vpack.c.bf16 %v158_v52, %v154_v50  ;;  %v160_v54 = vpop.f32.mrb[3].mxu1 }
 0x11f   :  { %v164_v55 = vpack.c.bf16 %v160_v54, %v156_v51 }
 0x121   :  { %490 = vmatprep.mubr.bf16.mxu0 %v164_v55 }
 0x122   :  { %491 = vmatmul.mubr.bf16.vlgmr.msra.gmra.mrb[0].mxu0 %v163_v53 }
 0x12b   :  { %v249_v56 = vpop.f32.mrb[4].mxu1 }
 0x12c   :  { %v251_v57 = vpop.f32.mrb[5].mxu1 }
 0x12d   :  { %v253_v58 = vpop.f32.mrb[6].mxu1 }
 0x12e   :  { %v258_v59 = vpack.c.bf16 %v253_v58, %v249_v56  ;;  %v255_v60 = vpop.f32.mrb[7].mxu1 }
 0x12f   :  { %v259_v61 = vpack.c.bf16 %v255_v60, %v251_v57 }
 0x131   :  { %500 = vmatprep.mubr.bf16.mxu0 %v259_v61 }
 0x132   :  { %501 = vmatmul.mubr.bf16.gmra.mrb[4].mxu0 %v258_v59 }
 0x1f5   :  { %v492_v62 = vpop.f32.mrb[0].mxu0 }
 0x1f6   :  { %511 = vst [vmem:[#allocation9] sm:$0xff] %v492_v62  ;;  %v494_v63 = vpop.f32.mrb[1].mxu0 }
 0x1f7   :  { %512 = vst [vmem:[#allocation9 + $0x8] sm:$0xff] %v494_v63  ;;  %v496_v0 = vpop.f32.mrb[2].mxu0 }
 0x1f8   :  { %513 = vst [vmem:[#allocation9 + $0x10] sm:$0xff] %v496_v0  ;;  %v498_v1 = vpop.f32.mrb[3].mxu0 }
 0x1f9   :  { %514 = vst [vmem:[#allocation9 + $0x18] sm:$0xff] %v498_v1 }
 0x205   :  { %v502_v2 = vpop.f32.mrb[4].mxu0 }
 0x206   :  { %515 = vst [vmem:[#allocation9 + $0x20] sm:$0xff] %v502_v2  ;;  %v504_v3 = vpop.f32.mrb[5].mxu0 }
 0x207   :  { %516 = vst [vmem:[#allocation9 + $0x28] sm:$0xff] %v504_v3  ;;  %v506_v4 = vpop.f32.mrb[6].mxu0 }
 0x208   :  { %517 = vst [vmem:[#allocation9 + $0x30] sm:$0xff] %v506_v4  ;;  %v508_v5 = vpop.f32.mrb[7].mxu0 }
 0x209   :  { %518 = vst [vmem:[#allocation9 + $0x38] sm:$0xff] %v508_v5 }
 0x20a   :  { %749 = shalt.err (!%p746_p0)
}
 0x20b   :  { %s750_s27 = scalar_lea.hbm %s856_s3, 1024 }
 0x20c   :  { %p751_p1 = scmp.ne.s32.totalorder %s856_s3, %s750_s27  ;;  %p754_p2 = scmp.lt.u32.totalorder %s750_s27, %s856_s3 }
 0x20e   :  { %p756_p3 = pnand %p754_p2, %p751_p1 }
 0x210   :  { %759 = shalt.err (!%p756_p3)
}
 0x211   :  { %s775_s5 = smov 256   ;;  %s776_s6 = smov 16  }
 0x212   :  { %530 = dma.vmem_to_hbm [thread:$0]  %s525_s22, 1024, %s856_s3, [#allocation5], %s775_s5, %s775_s5, %s776_s6  }
 0x213   :  { %764 = dma.done.wait [#allocation5], 1024  }
 0x214   :  { %765 = vsyncadd [#allocation5], 4294966272 }
 0x215   :  { %534 = vsyncpa [#allocation4], 1 }
 0x216   :  { %535 = vsyncpa [#allocation7], 1 }
 0x217   :  { %536 = vsyncpa [#allocation5], 1 }

</bundles_post_ra>
